<compile_context>
chip_gen: v7x
topology: tpu7x:2x2x1
jax: 0.10.0
libtpu: 0.0.40
codegen_flags: <defaults>
</compile_context>

<pallas_src>
import functools

import jax
import jax.numpy as jnp
from jax.experimental import pallas as pl
from jax.experimental.pallas import tpu as pltpu


def _round_up(x, m):
    return (x + m - 1) // m * m


def transition_kernel(x_ref, w_ref, shift_ref, o_ref, *, cin, wo):
    """Fused 1x1-conv + BN(inference) + ReLU + 2x2 avg-pool on one tile.

    x_ref:     (tile_rows, 2*cin)  channels-last; row r = (row-pair, h-parity,
               wo) flattened, lanes = [even-W pixel channels | odd-W pixel chans].
    w_ref:     (cin, cout_p)       conv weight with BN scale and 0.25 folded in.
    shift_ref: (1, cout_p)         folded conv-bias + BN shift (x 0.25), f32.
    o_ref:     (tile_rows // 2, cout_p)  pooled output rows (lane-dense).
    """
    w = w_ref[...]
    shift = shift_ref[...]

    # W-parity split lives in the lane axis (free vreg selection when
    # cin % 128 == 0; a cheap sub-vreg slice for tiny channel counts).
    x0 = x_ref[:, :cin]
    x1 = x_ref[:, cin:]

    # Per-pixel conv + shift + ReLU (ReLU must precede the pooling sum), then
    # the horizontal half of the 2x2 average (0.25 already folded into w/shift).
    y0 = jnp.maximum(jnp.dot(x0, w, preferred_element_type=jnp.float32) + shift, 0.0)
    y1 = jnp.maximum(jnp.dot(x1, w, preferred_element_type=jnp.float32) + shift, 0.0)
    s = y0 + y1                                            # (tile_rows, cout_p)

    # Vertical half of the pool: rows alternate [even-h row | odd-h row] in
    # blocks of wo, so split the sublane axis and add.  Layout-free when
    # wo % 8 == 0 (true for the sizes exercised below).
    rows, cp = s.shape
    s4 = s.reshape(rows // (2 * wo), 2, wo, cp)
    o = s4[:, 0, :, :] + s4[:, 1, :, :]                    # (pairs, wo, cout_p)
    o_ref[...] = o.reshape(rows // 2, cp).astype(o_ref.dtype)


def _vmem_budget_bytes():
    """Total-VMEM budget for this pallas_call.

    ~3/4 of physical VMEM, capped at 96 MiB: 96 MiB on v5e/v6e (128 MiB parts,
    whose default scoped limit of 16/32 MiB we raise explicitly) and 48 MiB on
    v7x (64 MiB part).  Falls back to a conservative 48 MiB if the query fails.
    """
    try:
        cap = int(pltpu.get_tpu_info().vmem_capacity_bytes)
    except Exception:
        cap = 64 << 20
    return min(cap * 3 // 4, 96 << 20)


def _choose_tile_pairs(n, ho, wo, cin, cout_p, x_itemsize, out_itemsize,
                       w_bytes, budget_bytes):
    """Largest legal row-pair tile whose double-buffered blocks fit the budget."""
    lane_x = _round_up(2 * cin, 128)          # VMEM lane padding of the x block

    def vmem_needed(tp):
        rows = 2 * tp * wo
        x_blk = _round_up(rows, 8) * lane_x * x_itemsize
        o_blk = _round_up(tp * wo, 8) * cout_p * out_itemsize
        return 2 * (x_blk + o_blk) + 2 * w_bytes + (1 << 20)   # 2x: double buffers

    # Legal tiles: out-block sublane dim (tp*wo) multiple of 8, or full extent.
    valid = [tp for tp in range(1, ho + 1) if (tp * wo) % 8 == 0]
    if ho not in valid:
        valid.append(ho)
    fitting = [tp for tp in valid if vmem_needed(tp) <= budget_bytes]
    pool = fitting if fitting else [min(valid)]
    tp = max(pool)
    # v7x megacore: keep >= 2 total grid steps so both TensorCores get work.
    if n == 1 and ho > 1:
        two_plus = [t for t in pool if t < ho]
        if two_plus:
            tp = max(two_plus)
    return tp


def transition_forward_nhwc(x_nhwc, conv_w, conv_b, gamma, beta, run_mean,
                            run_var, eps=1e-5, tile_pairs=None):
    """Conv1x1 -> BatchNorm(inference) -> ReLU -> AvgPool2d(2), channels-last.

    The only host-side ops touching the activation are free metadata reshapes;
    de-interleave, matmul, ReLU and pooling all happen inside the kernel.
    """
    N, H, W, Cin = x_nhwc.shape
    Cout = conv_w.shape[0]
    assert conv_w.shape == (Cout, Cin, 1, 1)
    if H % 2 or W % 2:
        # AvgPool2d(2) floors: drop a trailing odd row/col (rare; one slice).
        x_nhwc = x_nhwc[:, : (H // 2) * 2, : (W // 2) * 2, :]
        H, W = (H // 2) * 2, (W // 2) * 2
    Ho, Wo = H // 2, W // 2
    cout_p = _round_up(Cout, 128)

    # Fold conv bias + inference BN + 0.25 pool average into one (Cin, Cout)
    # scale and a per-channel shift:
    #   out = sum_{2x2} relu(x @ (0.25*s*W) + 0.25*(beta + s*(b - mean)))
    # with s = gamma / sqrt(var + eps).
    s = (gamma / jnp.sqrt(run_var + eps)).astype(jnp.float32)
    w = 0.25 * conv_w[:, :, 0, 0].astype(jnp.float32).T * s[None, :]      # (Cin, Cout)
    shift = 0.25 * (beta + s * (conv_b - run_mean)).astype(jnp.float32)   # (Cout,)

    w_p = jnp.zeros((Cin, cout_p), jnp.float32).at[:, :Cout].set(w)
    w_p = w_p.astype(x_nhwc.dtype)         # bf16 x -> bf16 weights (MXU-native)
    shift_p = jnp.zeros((1, cout_p), jnp.float32).at[0, :Cout].set(shift)

    # Free (metadata-only) view: rows = (h, wo), lanes = (W-parity, channel).
    x = x_nhwc.reshape(N, H * Wo, 2 * Cin)

    budget = _vmem_budget_bytes()
    if tile_pairs is None:
        tile_pairs = _choose_tile_pairs(
            N, Ho, Wo, Cin, cout_p, x.dtype.itemsize, x.dtype.itemsize,
            _round_up(Cin, 8) * cout_p * w_p.dtype.itemsize, budget)
    tile_pairs = min(tile_pairs, Ho)
    assert (tile_pairs * Wo) % 8 == 0 or tile_pairs == Ho
    tile_rows = 2 * tile_pairs * Wo

    kernel = functools.partial(transition_kernel, cin=Cin, wo=Wo)
    out = pl.pallas_call(
        kernel,
        out_shape=jax.ShapeDtypeStruct((N, Ho * Wo, cout_p), x_nhwc.dtype),
        grid_spec=pltpu.PrefetchScalarGridSpec(
            num_scalar_prefetch=0,
            grid=(N, pl.cdiv(Ho, tile_pairs)),
            in_specs=[
                pl.BlockSpec((pl.Squeezed(), tile_rows, 2 * Cin),
                             lambda n, t: (n, t, 0)),
                # TODO(synk): single-buffer (pl.Buffered(1)) these constant
                # blocks to reclaim VMEM on v7x; budget above already accounts
                # for the double-buffered copy.
                pl.BlockSpec((Cin, cout_p), lambda n, t: (0, 0)),
                pl.BlockSpec((1, cout_p), lambda n, t: (0, 0)),
            ],
            out_specs=pl.BlockSpec((pl.Squeezed(), tile_rows // 2, cout_p),
                                   lambda n, t: (n, t, 0)),
        ),
        compiler_params=pltpu.CompilerParams(
            dimension_semantics=("parallel", "parallel"),
            vmem_limit_bytes=int(budget)),
    )(x, w_p, shift_p)

    # (N, Ho*Wo, cout_p) -> (N, Ho, Wo, Cout).  When Cout % 128 == 0 (typical
    # real transitions) the slice is a no-op and the reshape is metadata-only.
    return out[:, :, :Cout].reshape(N, Ho, Wo, Cout)


def transition_forward(x_nchw, conv_w, conv_b, gamma, beta, run_mean, run_var,
                       eps=1e-5, tile_pairs=None):
    """PyTorch-layout (NCHW) convenience wrapper.

    The two transposes below are exactly the wrapper HBM passes the optimized
    path avoids -- in a channels-last pipeline call transition_forward_nhwc
    directly and they disappear.
    """
    x_nhwc = jnp.transpose(x_nchw, (0, 2, 3, 1))
    y = transition_forward_nhwc(x_nhwc, conv_w, conv_b, gamma, beta, run_mean,
                                run_var, eps=eps, tile_pairs=tile_pairs)
    return jnp.transpose(y, (0, 3, 1, 2))


def reference_forward(x, conv_w, conv_b, gamma, beta, mean, var, eps=1e-5):
    y = jax.lax.conv_general_dilated(
        x, conv_w, window_strides=(1, 1), padding="VALID",
        dimension_numbers=("NCHW", "OIHW", "NCHW"))
    y = y + conv_b.reshape(1, -1, 1, 1)
    y = (gamma.reshape(1, -1, 1, 1) * (y - mean.reshape(1, -1, 1, 1))
         / jnp.sqrt(var.reshape(1, -1, 1, 1) + eps) + beta.reshape(1, -1, 1, 1))
    y = jnp.maximum(y, 0.0)
    N, C, H, W = y.shape
    return y.reshape(N, C, H // 2, 2, W // 2, 2).mean(axis=(3, 5))


if __name__ == "__main__":
    # Transition(m=4): Conv2d(4, 2, 1) -> BN(2) -> ReLU -> AvgPool2d(2)
    # TODO(synk): BatchNorm is evaluated with provided running stats (inference
    # mode); training-mode batch statistics are not computed.
    N, m, H, W = 2, 4, 16, 16
    Cout = m // 2

    key = jax.random.PRNGKey(0)
    k = jax.random.split(key, 7)
    x = jax.random.normal(k[0], (N, m, H, W), dtype=jnp.float32)
    conv_w = jax.random.normal(k[1], (Cout, m, 1, 1), dtype=jnp.float32) * 0.3
    conv_b = jax.random.normal(k[2], (Cout,), dtype=jnp.float32) * 0.1
    gamma = jax.random.uniform(k[3], (Cout,), minval=0.5, maxval=1.5)
    beta = jax.random.normal(k[4], (Cout,), dtype=jnp.float32) * 0.1
    run_mean = jax.random.normal(k[5], (Cout,), dtype=jnp.float32) * 0.1
    run_var = jax.random.uniform(k[6], (Cout,), minval=0.5, maxval=1.5)

    ref = jax.block_until_ready(
        reference_forward(x, conv_w, conv_b, gamma, beta, run_mean, run_var))

    # f32 path through the NCHW wrapper (PyTorch semantics), auto tile.
    out = jax.block_until_ready(
        transition_forward(x, conv_w, conv_b, gamma, beta, run_mean, run_var))
    assert out.shape == (N, Cout, H // 2, W // 2), out.shape
    assert jnp.allclose(out, ref, atol=1e-5, rtol=1e-5), float(
        jnp.max(jnp.abs(out - ref)))

    # Forced small tile: exercises the multi-tile spatial grid path.
    out_tiled = jax.block_until_ready(
        transition_forward(x, conv_w, conv_b, gamma, beta, run_mean, run_var,
                           tile_pairs=2))
    assert jnp.allclose(out_tiled, ref, atol=1e-5, rtol=1e-5), float(
        jnp.max(jnp.abs(out_tiled - ref)))

    # bf16 activation path (halves the dominant HBM stream); tolerance
    # re-baselined for bf16 inputs/weights.
    x_bf16 = jnp.transpose(x, (0, 2, 3, 1)).astype(jnp.bfloat16)
    out_bf16 = jax.block_until_ready(
        transition_forward_nhwc(x_bf16, conv_w, conv_b, gamma, beta, run_mean,
                                run_var))
    ref_nhwc = jnp.transpose(ref, (0, 2, 3, 1))
    err = float(jnp.max(jnp.abs(out_bf16.astype(jnp.float32) - ref_nhwc)))
    assert jnp.allclose(out_bf16.astype(jnp.float32), ref_nhwc,
                        atol=6e-2, rtol=6e-2), err

    print("KERNEL_OK")
</pallas_src>

<mosaic_0001>
module attributes {stable_mosaic.version = 11 : i64} {
  func.func @transition_kernel(%arg0: i32, %arg1: i32, %arg2: memref<1x128x8xf32, #tpu.memory_space<vmem>>, %arg3: memref<4x128xf32, #tpu.memory_space<vmem>>, %arg4: memref<1x128xf32, #tpu.memory_space<vmem>>, %arg5: memref<1x64x128xf32, #tpu.memory_space<vmem>>) attributes {dimension_semantics = [#tpu.dimension_semantics<parallel>, #tpu.dimension_semantics<parallel>], iteration_bounds = array<i64: 2, 1>, scalar_prefetch = 0 : i64, scratch_operands = 0 : i64, tpu.core_type = #tpu.core_type<tc>, window_params = [{transform_indices = @transform_0, window_bounds = array<i64: 1, 128, 8>}, {pipeline_mode = #tpu.pipeline_mode<synchronous>, transform_indices = @transform_1, window_bounds = array<i64: 4, 128>}, {pipeline_mode = #tpu.pipeline_mode<synchronous>, transform_indices = @transform_2, window_bounds = array<i64: 1, 128>}, {transform_indices = @transform_3, window_bounds = array<i64: 1, 64, 128>}]} {
    %c0 = arith.constant 0 : index
    %c0_0 = arith.constant 0 : index
    %0 = vector.load %arg3[%c0, %c0_0] : memref<4x128xf32, #tpu.memory_space<vmem>>, vector<4x128xf32>
    %c0_1 = arith.constant 0 : index
    %c0_2 = arith.constant 0 : index
    %1 = vector.load %arg4[%c0_1, %c0_2] : memref<1x128xf32, #tpu.memory_space<vmem>>, vector<1x128xf32>
    %c0_3 = arith.constant 0 : index
    %c0_4 = arith.constant 0 : index
    %c0_5 = arith.constant 0 : index
    %2 = vector.load %arg2[%c0_3, %c0_4, %c0_5] : memref<1x128x8xf32, #tpu.memory_space<vmem>>, vector<1x128x4xf32>
    %3 = vector.shape_cast %2 : vector<1x128x4xf32> to vector<128x4xf32>
    %c0_6 = arith.constant 0 : index
    %c0_7 = arith.constant 0 : index
    %c4 = arith.constant 4 : index
    %4 = vector.load %arg2[%c0_6, %c0_7, %c4] : memref<1x128x8xf32, #tpu.memory_space<vmem>>, vector<1x128x4xf32>
    %5 = vector.shape_cast %4 : vector<1x128x4xf32> to vector<128x4xf32>
    %cst = arith.constant dense<0.000000e+00> : vector<128x128xf32>
    %6 = tpu.matmul %3, %0, %cst {dimension_numbers = #tpu.dot_dimension_numbers<[1], [0], [0], [1], [0, 0, 1, 1], [], []>} : vector<128x4xf32>, vector<4x128xf32>, vector<128x128xf32> -> vector<128x128xf32>
    %7 = vector.broadcast %1 : vector<1x128xf32> to vector<128x128xf32>
    %8 = arith.addf %6, %7 : vector<128x128xf32>
    %cst_8 = arith.constant 0.000000e+00 : f32
    %9 = vector.broadcast %cst_8 : f32 to vector<128x128xf32>
    %10 = arith.maximumf %8, %9 : vector<128x128xf32>
    %cst_9 = arith.constant dense<0.000000e+00> : vector<128x128xf32>
    %11 = tpu.matmul %5, %0, %cst_9 {dimension_numbers = #tpu.dot_dimension_numbers<[1], [0], [0], [1], [0, 0, 1, 1], [], []>} : vector<128x4xf32>, vector<4x128xf32>, vector<128x128xf32> -> vector<128x128xf32>
    %12 = vector.broadcast %1 : vector<1x128xf32> to vector<128x128xf32>
    %13 = arith.addf %11, %12 : vector<128x128xf32>
    %cst_10 = arith.constant 0.000000e+00 : f32
    %14 = vector.broadcast %cst_10 : f32 to vector<128x128xf32>
    %15 = arith.maximumf %13, %14 : vector<128x128xf32>
    %16 = arith.addf %10, %15 : vector<128x128xf32>
    %17 = vector.shape_cast %16 : vector<128x128xf32> to vector<8x2x8x128xf32>
    %18 = vector.extract_strided_slice %17 {offsets = [0, 0, 0, 0], sizes = [8, 1, 8, 128], strides = [1, 1, 1, 1]} : vector<8x2x8x128xf32> to vector<8x1x8x128xf32>
    %19 = vector.shape_cast %18 : vector<8x1x8x128xf32> to vector<8x8x128xf32>
    %20 = vector.extract_strided_slice %17 {offsets = [0, 1, 0, 0], sizes = [8, 1, 8, 128], strides = [1, 1, 1, 1]} : vector<8x2x8x128xf32> to vector<8x1x8x128xf32>
    %21 = vector.shape_cast %20 : vector<8x1x8x128xf32> to vector<8x8x128xf32>
    %22 = arith.addf %19, %21 : vector<8x8x128xf32>
    %23 = vector.shape_cast %22 : vector<8x8x128xf32> to vector<64x128xf32>
    %c0_11 = arith.constant 0 : index
    %c0_12 = arith.constant 0 : index
    %c0_13 = arith.constant 0 : index
    %24 = vector.load %arg5[%c0_11, %c0_12, %c0_13] : memref<1x64x128xf32, #tpu.memory_space<vmem>>, vector<1x64x128xf32>
    %25 = vector.shape_cast %24 : vector<1x64x128xf32> to vector<64x128xf32>
    %26 = vector.shape_cast %23 : vector<64x128xf32> to vector<1x64x128xf32>
    tpu.vector_store %arg5[%c0_11, %c0_12, %c0_13], %26 {strides = array<i32>} : memref<1x64x128xf32, #tpu.memory_space<vmem>>, vector<1x64x128xf32>,
    return
  }
  func.func @transform_0(%arg0: i32, %arg1: i32) -> (i32, i32, i32) {
    %c0_i32 = arith.constant 0 : i32
    %c0_i32_0 = arith.constant 0 : i32
    return %arg0, %arg1, %c0_i32 : i32, i32, i32
  }
  func.func @transform_1(%arg0: i32, %arg1: i32) -> (i32, i32) {
    %c0_i32 = arith.constant 0 : i32
    %c0_i32_0 = arith.constant 0 : i32
    %c0_i32_1 = arith.constant 0 : i32
    return %c0_i32, %c0_i32_0 : i32, i32
  }
  func.func @transform_2(%arg0: i32, %arg1: i32) -> (i32, i32) {
    %c0_i32 = arith.constant 0 : i32
    %c0_i32_0 = arith.constant 0 : i32
    %c0_i32_1 = arith.constant 0 : i32
    return %c0_i32, %c0_i32_0 : i32, i32
  }
  func.func @transform_3(%arg0: i32, %arg1: i32) -> (i32, i32, i32) {
    %c0_i32 = arith.constant 0 : i32
    %c0_i32_0 = arith.constant 0 : i32
    return %arg0, %arg1, %c0_i32 : i32, i32, i32
  }
}

</mosaic_0001>

<bundles_post_ra>
// kernel: tpu_custom_call.1
= control target key start
LH: loop header
LB: loop body
LE: loop exit
PB: predicated region body
PF: predicated region fallthrough
CT: control target
= control target key end

     0   :  { %8 = vsyncpa [#allocation3], 0  ;;  %s1342_s0 = inlined_call_operand.vmem [shape: f32[2,128,8], index: 0, kind: input, shape index: {}]   ;;  %s1343_s1 = inlined_call_operand.vmem [shape: f32[4,128], index: 1, kind: input, shape index: {}]   ;;  %s1344_s2 = inlined_call_operand.vmem [shape: f32[1,128], index: 2, kind: input, shape index: {}]   ;;  %s1345_s3 = inlined_call_operand.hbm [shape: f32[2,64,128], index: 3, kind: output, shape index: {}]  }
   0x1   :  { %10 = vsyncpa [#allocation3 + $0x1], 0  ;;  %s1088_s12 = smov 0   ;;  %s1090_s13 = smov 0  }
   0x2   :  { %s1092_s14 = smov 0   ;;  %s1094_s15 = smov 0  }
   0x3   :  { %s1096_s16 = smov 0   ;;  %s1098_s17 = smov 0  }
   0x4 LB: > { %s790_s18 = sadd.s32 4294967295, %s1062_s17   ;;  %s791_s19 = sadd.s32 4294967294, %s1062_s17   ;;  %s1062_s17 = sphi %s1098_s17, %s16_s17   ;;  %s1058_s16 = sphi %s1096_s16, %s1352_s16   ;;  %s1054_s15 = sphi %s1094_s15, %s1351_s15   ;;  %s1050_s14 = sphi %s1092_s14, %s1350_s14   ;;  %s1046_s13 = sphi %s1090_s13, %s1349_s13   ;;  %s1042_s12 = sphi %s1088_s12, %s1348_s12  }
   0x5   : > { %s28_s20 = sadd.s32 1, %s1058_s16  ;;  %s107_s21 = sadd.s32 1, %s1050_s14 }
   0x6   : > { %p30_p0 = scmp.ge.s32.totalorder %s28_s20, 2  ;;  %p117_p1 = scmp.ne.s32.totalorder %s1050_s14, %s1046_s13 }
   0x7   : > { %p118_p2 = scmp.eq.s32.totalorder %s790_s18, 1  ;;  %p123_p3 = scmp.ne.s32.totalorder %s1046_s13, %s1042_s12 }
   0x8   : > { %s1354_s20 = smov (%p30_p0, %s28_s20), 0  ;;  %p124_p5 = scmp.eq.s32.totalorder %s791_s19, 1 }
   0x9   : > { %p1128_p4 = por %p118_p2, %p117_p1  ;;  %s102_s23 = ssub.s32 %s1058_s16, %s1354_s20 }
   0xa   : > { %p794_p6 = scmp.ge.s32.totalorder %s1062_s17, 1  ;;  %p105_p7 = scmp.eq.s32.totalorder %s102_s23, 0 }
   0xb   : > { %p1135_p8 = por %p124_p5, %p123_p3  ;;  %p161_p9 = scmp.lt.s32.totalorder %s1062_s17, 3 }
   0xc   : > { %s1141_s25 = scalar_select %p105_p7, %s1050_s14, %s107_s21  }
   0xd   : > { %p162_p10 = pnand %p794_p6, %p161_p9 }
   0xe   : > { %p190_p11 = scmp.lt.s32.totalorder (!%p162_p10), %s1054_s15, 1  ;;  %v200_v0 = vld [vmem:[%s1343_s1] sm:$0xf] (!%p162_p10)  ;;  %vm273_vm0 = vcmask (!%p162_p10), 1043456   ;;  %s1064_s6 = smov (!%p162_p10), 124   ;;  %vm224_vm1 = vcmask (!%p162_p10), 31744  }
   0xf   : > { %165 = sbr.rel (%p162_p10) target bundleno = 410 (0x19a), region = 32  ;;  %874 = vmatprep.subr.msk.mxu0 (!%p162_p10), %vm273_vm0, %v200_v0  ;;  %900 = vmatprep.subr.msk.mxu1 (!%p162_p10), %vm273_vm0, %v200_v0  ;;  %v1232_v49 = vld [vmem:[%s1344_s2] ss:$0 sm:$0xff] (!%p162_p10)  ;;  %s186_s9 = sand.u32 (!%p162_p10), 1, %s1046_s13  }
  0x10   : > { %875 = vmatpush3.msk.msra.mxu0 (!%p162_p10), %vm273_vm0, %v200_v0  ;;  %901 = vmatpush3.msk.msra.mxu1 (!%p162_p10), %vm273_vm0, %v200_v0  ;;  %s795_s10 = sshll.u32 (!%p162_p10), %s186_s9, 6  ;;  %s839_s18 = sshll.u32 (!%p162_p10), %s1054_s15, 10 }
  0x11   : > { %s1249_s11 = scalar_lea.vmem (!%p162_p10), [#allocation2], %s795_s10  ;;  %s1289_s26 = scalar_lea.hbm (!%p162_p10), %s1345_s3, %s839_s18 }
  0x12   : > { %s711_s19 = sshll.u32 (!%p162_p10), %s1249_s11, 4  ;;  %s1296_s27 = scalar_lea.sflag (!%p162_p10), [#allocation3], %s186_s9  ;;  %s1291_s19 = int_to_ptr.vmem [resolvable:$true] %s711_s19 }
  0x16   : > { %s191_s28 = scalar_select %p190_p11, %s1054_s15, 1 }
  0x17   : > { %s984_s15 = scalar_lea.vmem %s1291_s19, 1024 }
  0x18   : > { %s838_s29 = sshll.u32 %s191_s28, 7  ;;  %p985_p12 = scmp.ne.s32.totalorder %s1291_s19, %s984_s15 }
  0x19   : > { %s1151_s5 = scalar_lea.vmem %s1342_s0, %s838_s29  ;;  %s1065_s28 = smov [#allocation2]  }
  0x1a   : > { %v202_v1 = vld [vmem:[%s1151_s5] sm:$0xff]  ;;  %v204_v2 = vld [vmem:[%s1151_s5 + $0x10] sm:$0xff]  ;;  %v203_v3 = vld [vmem:[%s1151_s5 + $0x8] sm:$0xff]  ;;  %p986_p13 = pnand %p985_p12, %p1128_p4  ;;  %s988_s29 = sshll.u32 %s1065_s28, 4  ;;  %s989_s29 = int_to_ptr.vmem [resolvable:$false] %s988_s29 }
  0x1b   : > { %438 = vrot.lane.b32.xlu0 %v202_v1, %s1064_s6  ;;  %442 = vrot.lane.b32.xlu1 %v204_v2, %s1064_s6  ;;  %v205_v4 = vld [vmem:[%s1151_s5 + $0x18] sm:$0xff]  ;;  %v206_v5 = vld [vmem:[%s1151_s5 + $0x20] sm:$0xff]  ;;  %s990_s30 = scalar_lea.vmem %s989_s29, 2048  ;;  %p991_p1 = scmp.lt.s32.totalorder %s1291_s19, %s989_s29 }
  0x1c   : > { %876 = vmatprep.mubr.msk.f32.mxu0 %vm224_vm1, %v202_v1  ;;  %v207_v6 = vld [vmem:[%s1151_s5 + $0x28] sm:$0xff]  ;;  %v208_v7 = vld [vmem:[%s1151_s5 + $0x30] sm:$0xff]  ;;  %v209_v8 = vld [vmem:[%s1151_s5 + $0x38] sm:$0xff]  ;;  %p987_p0 = pneg %p986_p13  ;;  %p992_p2 = scmp.lt.s32.totalorder %s990_s30, %s984_s15 }
  0x1d   : > { %877 = vmatmul.mubr.msk.f32.vlgmr.msra.gmra.mrb[0].mxu0 %vm224_vm1, %v203_v3  ;;  %v210_v9 = vld [vmem:[%s1151_s5 + $0x40] sm:$0xff]  ;;  %v211_v10 = vld [vmem:[%s1151_s5 + $0x48] sm:$0xff]  ;;  %v212_v11 = vld [vmem:[%s1151_s5 + $0x50] sm:$0xff] }
  0x1e   : > { %879 = vmatprep.mubr.msk.f32.mxu0 %vm224_vm1, %v204_v2  ;;  %v213_v12 = vld [vmem:[%s1151_s5 + $0x58] sm:$0xff]  ;;  %v214_v13 = vld [vmem:[%s1151_s5 + $0x60] sm:$0xff]  ;;  %v215_v14 = vld [vmem:[%s1151_s5 + $0x68] sm:$0xff]  ;;  %p993_p3 = por %p992_p2, %p991_p1 }
  0x1f   : > { %440 = vrot.lane.b32.xlu0 %v203_v3, %s1064_s6  ;;  %444 = vrot.lane.b32.xlu1 %v205_v4, %s1064_s6  ;;  %v216_v15 = vld [vmem:[%s1151_s5 + $0x70] sm:$0xff]  ;;  %v217_v16 = vld [vmem:[%s1151_s5 + $0x78] sm:$0xff] }
  0x20   : > { %p994_p5 = pnand %p993_p3, %p987_p0 }
  0x21   : > { %880 = vmatmul.mubr.msk.f32.gmra.mrb[2].mxu0 %vm224_vm1, %v205_v4 }
  0x22   : > { %882 = vmatprep.mubr.msk.f32.mxu0 %vm224_vm1, %v206_v5 }
  0x23   : > { %446 = vrot.lane.b32.xlu0 %v206_v5, %s1064_s6  ;;  %448 = vrot.lane.b32.xlu1 %v207_v6, %s1064_s6 }
  0x25   : > { %883 = vmatmul.mubr.msk.f32.gmra.mrb[4].mxu0 %vm224_vm1, %v207_v6 }
  0x26   : > { %885 = vmatprep.mubr.msk.f32.mxu0 %vm224_vm1, %v208_v7 }
  0x27   : > { %450 = vrot.lane.b32.xlu0 %v208_v7, %s1064_s6  ;;  %452 = vrot.lane.b32.xlu1 %v209_v8, %s1064_s6 }
  0x29   : > { %886 = vmatmul.mubr.msk.f32.gmra.mrb[6].mxu0 %vm224_vm1, %v209_v8 }
  0x2a   : > { %888 = vmatprep.mubr.msk.f32.mxu0 %vm224_vm1, %v210_v9 }
  0x2b   : > { %454 = vrot.lane.b32.xlu0 %v210_v9, %s1064_s6  ;;  %456 = vrot.lane.b32.xlu1 %v211_v10, %s1064_s6 }
  0x2d   : > { %889 = vmatmul.mubr.msk.f32.gmra.mrb[8].mxu0 %vm224_vm1, %v211_v10 }
  0x2e   : > { %891 = vmatprep.mubr.msk.f32.mxu0 %vm224_vm1, %v212_v11 }
  0x2f   : > { %458 = vrot.lane.b32.xlu0 %v212_v11, %s1064_s6  ;;  %460 = vrot.lane.b32.xlu1 %v213_v12, %s1064_s6 }
  0x31   : > { %892 = vmatmul.mubr.msk.f32.gmra.mrb[10].mxu0 %vm224_vm1, %v213_v12 }
  0x32   : > { %894 = vmatprep.mubr.msk.f32.mxu0 %vm224_vm1, %v214_v13 }
  0x33   : > { %462 = vrot.lane.b32.xlu0 %v214_v13, %s1064_s6  ;;  %464 = vrot.lane.b32.xlu1 %v215_v14, %s1064_s6 }
  0x35   : > { %895 = vmatmul.mubr.msk.f32.gmra.mrb[12].mxu0 %vm224_vm1, %v215_v14 }
  0x36   : > { %897 = vmatprep.mubr.msk.f32.mxu0 %vm224_vm1, %v216_v15 }
  0x37   : > { %466 = vrot.lane.b32.xlu0 %v216_v15, %s1064_s6  ;;  %468 = vrot.lane.b32.xlu1 %v217_v16, %s1064_s6 }
  0x39   : > { %898 = vmatmul.mubr.msk.f32.gmra.mrb[14].mxu0 %vm224_vm1, %v217_v16 }
  0x8d   : > { %v439_v17 = vpop.permute.xlu0 %438  ;;  %v443_v18 = vpop.permute.xlu1 %442 }
  0x8e   : > { %902 = vmatprep.mubr.msk.f32.mxu1 %vm224_vm1, %v439_v17 }
  0x91   : > { %v441_v19 = vpop.permute.xlu0 %440  ;;  %v445_v20 = vpop.permute.xlu1 %444 }
  0x92   : > { %903 = vmatmul.mubr.msk.f32.vlgmr.msra.gmra.mrb[0].mxu1 %vm224_vm1, %v441_v19 }
  0x93   : > { %905 = vmatprep.mubr.msk.f32.mxu1 %vm224_vm1, %v443_v18 }
  0x95   : > { %v447_v21 = vpop.permute.xlu0 %446  ;;  %v449_v22 = vpop.permute.xlu1 %448 }
  0x96   : > { %906 = vmatmul.mubr.msk.f32.gmra.mrb[2].mxu1 %vm224_vm1, %v445_v20 }
  0x97   : > { %908 = vmatprep.mubr.msk.f32.mxu1 %vm224_vm1, %v447_v21 }
  0x99   : > { %v451_v23 = vpop.permute.xlu0 %450  ;;  %v453_v24 = vpop.permute.xlu1 %452 }
  0x9a   : > { %909 = vmatmul.mubr.msk.f32.gmra.mrb[4].mxu1 %vm224_vm1, %v449_v22 }
  0x9b   : > { %911 = vmatprep.mubr.msk.f32.mxu1 %vm224_vm1, %v451_v23 }
  0x9d   : > { %v455_v25 = vpop.permute.xlu0 %454  ;;  %v457_v26 = vpop.permute.xlu1 %456 }
  0x9e   : > { %912 = vmatmul.mubr.msk.f32.gmra.mrb[6].mxu1 %vm224_vm1, %v453_v24 }
  0x9f   : > { %914 = vmatprep.mubr.msk.f32.mxu1 %vm224_vm1, %v455_v25 }
  0xa1   : > { %v459_v27 = vpop.permute.xlu0 %458  ;;  %v461_v28 = vpop.permute.xlu1 %460 }
  0xa2   : > { %915 = vmatmul.mubr.msk.f32.gmra.mrb[8].mxu1 %vm224_vm1, %v457_v26 }
  0xa3   : > { %917 = vmatprep.mubr.msk.f32.mxu1 %vm224_vm1, %v459_v27 }
  0xa5   : > { %v463_v29 = vpop.permute.xlu0 %462  ;;  %v465_v30 = vpop.permute.xlu1 %464 }
  0xa6   : > { %918 = vmatmul.mubr.msk.f32.gmra.mrb[10].mxu1 %vm224_vm1, %v461_v28 }
  0xa7   : > { %920 = vmatprep.mubr.msk.f32.mxu1 %vm224_vm1, %v463_v29 }
  0xa9   : > { %v467_v31 = vpop.permute.xlu0 %466  ;;  %v469_v32 = vpop.permute.xlu1 %468 }
  0xaa   : > { %921 = vmatmul.mubr.msk.f32.gmra.mrb[12].mxu1 %vm224_vm1, %v465_v30 }
  0xab   : > { %923 = vmatprep.mubr.msk.f32.mxu1 %vm224_vm1, %v467_v31 }
  0xae   : > { %924 = vmatmul.mubr.msk.f32.gmra.mrb[14].mxu1 %vm224_vm1, %v469_v32 }
  0xf0   : > { %v878_v33 = vpop.f32.mrb[0].mxu0 }
  0xf1   : > { %v343_v34 = vpop.f32.mrb[1].mxu0  ;;  %v349_v50 = vadd.f32 %v878_v33, %v1232_v49 }
  0xf2   : > { %v344_v51 = vadd.f32 %v1232_v49, %v343_v34 }
  0xf3   : > { %v423_v53 = vmax.f32 %v349_v50, 0.0 }
  0xf4   : > { %v881_v35 = vpop.f32.mrb[2].mxu0  ;;  %v422_v57 = vmax.f32 %v344_v51, 0.0 }
  0xf5   : > { %v353_v36 = vpop.f32.mrb[3].mxu0  ;;  %v359_v56 = vadd.f32 %v881_v35, %v1232_v49 }
  0xf6   : > { %v354_v59 = vadd.f32 %v1232_v49, %v353_v36 }
  0xf7   : > { %v425_v0 = vmax.f32 %v359_v56, 0.0 }
  0xf8   : > { %v884_v37 = vpop.f32.mrb[4].mxu0  ;;  %v424_v5 = vmax.f32 %v354_v59, 0.0 }
  0xf9   : > { %v363_v38 = vpop.f32.mrb[5].mxu0  ;;  %v369_v3 = vadd.f32 %v884_v37, %v1232_v49 }
  0xfa   : > { %v364_v7 = vadd.f32 %v1232_v49, %v363_v38 }
  0xfb   : > { %v427_v13 = vmax.f32 %v369_v3, 0.0 }
  0xfc   : > { %v887_v39 = vpop.f32.mrb[6].mxu0  ;;  %v426_v18 = vmax.f32 %v364_v7, 0.0 }
  0xfd   : > { %v373_v40 = vpop.f32.mrb[7].mxu0  ;;  %v379_v16 = vadd.f32 %v887_v39, %v1232_v49 }
  0xfe   : > { %v374_v20 = vadd.f32 %v1232_v49, %v373_v40 }
  0xff   : > { %v429_v26 = vmax.f32 %v379_v16, 0.0 }
 0x100   : > { %v890_v41 = vpop.f32.mrb[8].mxu0  ;;  %v428_v31 = vmax.f32 %v374_v20, 0.0 }
 0x101   : > { %v383_v42 = vpop.f32.mrb[9].mxu0  ;;  %v389_v29 = vadd.f32 %v890_v41, %v1232_v49 }
 0x102   : > { %v384_v33 = vadd.f32 %v1232_v49, %v383_v42 }
 0x103   : > { %v431_v39 = vmax.f32 %v389_v29, 0.0 }
 0x104   : > { %v1217_v43 = vpop.f32.mrb[10].mxu0 }
 0x105   : > { %v1219_v44 = vpop.f32.mrb[11].mxu0  ;;  %v399_v41 = vadd.f32 %v1217_v43, %v1232_v49 }
 0x106   : > { %v394_v42 = vadd.f32 %v1232_v49, %v1219_v44 }
 0x107   : > { %v433_v59 = vmax.f32 %v399_v41, 0.0 }
 0x108   : > { %v1221_v45 = vpop.f32.mrb[12].mxu0 }
 0x109   : > { %v1223_v46 = vpop.f32.mrb[13].mxu0  ;;  %v409_v43 = vadd.f32 %v1221_v45, %v1232_v49 }
 0x10a   : > { %v404_v44 = vadd.f32 %v1232_v49, %v1223_v46 }
 0x10c   : > { %v1225_v47 = vpop.f32.mrb[14].mxu0 }
 0x10d   : > { %v1227_v48 = vpop.f32.mrb[15].mxu0  ;;  %v419_v45 = vadd.f32 %v1225_v47, %v1232_v49 }
 0x10e   : > { %v414_v46 = vadd.f32 %v1232_v49, %v1227_v48 }
 0x110   : > { %v436_v20 = vmax.f32 %v414_v46, 0.0 }
 0x165   : > { %v904_v52 = vpop.f32.mrb[0].mxu1 }
 0x166   : > { %v574_v54 = vadd.f32 %v904_v52, %v1232_v49  ;;  %v568_v55 = vpop.f32.mrb[1].mxu1  ;;  %v430_v52 = vmax.f32 %v384_v33, 0.0 }
 0x167   : > { %v569_v58 = vadd.f32 %v1232_v49, %v568_v55 }
 0x168   : > { %v648_v60 = vmax.f32 %v574_v54, 0.0 }
 0x169   : > { %v647_v61 = vmax.f32 %v569_v58, 0.0  ;;  %v907_v62 = vpop.f32.mrb[2].mxu1 }
 0x16a   : > { %v664_v63 = vadd.f32 %v648_v60, %v423_v53  ;;  %v584_v1 = vadd.f32 %v907_v62, %v1232_v49  ;;  %v578_v2 = vpop.f32.mrb[3].mxu1 }
 0x16b   : > { %v663_v4 = vadd.f32 %v647_v61, %v422_v57  ;;  %v579_v6 = vadd.f32 %v1232_v49, %v578_v2 }
 0x16c   : > { %v650_v8 = vmax.f32 %v584_v1, 0.0 }
 0x16d   : > { %v679_v9 = vadd.f32 %v664_v63, %v663_v4  ;;  %v649_v10 = vmax.f32 %v579_v6, 0.0  ;;  %v910_v11 = vpop.f32.mrb[4].mxu1  ;;  %v432_v63 = vmax.f32 %v394_v42, 0.0  ;;  %v435_v6 = vmax.f32 %v409_v43, 0.0 }
 0x16e   : > { %v666_v12 = vadd.f32 %v650_v8, %v425_v0  ;;  %v594_v14 = vadd.f32 %v910_v11, %v1232_v49  ;;  %v588_v15 = vpop.f32.mrb[5].mxu1 }
 0x16f   : > { %687 = vst [vmem:[%s1249_s11] sm:$0xff] %v679_v9  ;;  %v665_v17 = vadd.f32 %v649_v10, %v424_v5  ;;  %v589_v19 = vadd.f32 %v1232_v49, %v588_v15  ;;  %v434_v10 = vmax.f32 %v404_v44, 0.0 }
 0x170   : > { %v652_v21 = vmax.f32 %v594_v14, 0.0 }
 0x171   : > { %v680_v22 = vadd.f32 %v666_v12, %v665_v17  ;;  %v651_v23 = vmax.f32 %v589_v19, 0.0  ;;  %v913_v24 = vpop.f32.mrb[6].mxu1  ;;  %v437_v17 = vmax.f32 %v419_v45, 0.0 }
 0x172   : > { %v668_v25 = vadd.f32 %v652_v21, %v427_v13  ;;  %v604_v27 = vadd.f32 %v913_v24, %v1232_v49  ;;  %v598_v28 = vpop.f32.mrb[7].mxu1 }
 0x173   : > { %688 = vst [vmem:[%s1249_s11 + $0x8] sm:$0xff] %v680_v22  ;;  %v667_v30 = vadd.f32 %v651_v23, %v426_v18  ;;  %v599_v32 = vadd.f32 %v1232_v49, %v598_v28 }
 0x174   : > { %v654_v34 = vmax.f32 %v604_v27, 0.0 }
 0x175   : > { %v681_v35 = vadd.f32 %v668_v25, %v667_v30  ;;  %v653_v36 = vmax.f32 %v599_v32, 0.0  ;;  %v916_v37 = vpop.f32.mrb[8].mxu1 }
 0x176   : > { %v670_v38 = vadd.f32 %v654_v34, %v429_v26  ;;  %v614_v40 = vadd.f32 %v916_v37, %v1232_v49  ;;  %v608_v50 = vpop.f32.mrb[9].mxu1 }
 0x177   : > { %689 = vst [vmem:[%s1249_s11 + $0x10] sm:$0xff] %v681_v35  ;;  %v669_v51 = vadd.f32 %v653_v36, %v428_v31  ;;  %v609_v53 = vadd.f32 %v1232_v49, %v608_v50 }
 0x178   : > { %v656_v54 = vmax.f32 %v614_v40, 0.0 }
 0x179   : > { %v682_v55 = vadd.f32 %v670_v38, %v669_v51  ;;  %v655_v56 = vmax.f32 %v609_v53, 0.0  ;;  %v919_v57 = vpop.f32.mrb[10].mxu1 }
 0x17a   : > { %v672_v58 = vadd.f32 %v656_v54, %v431_v39  ;;  %v624_v60 = vadd.f32 %v919_v57, %v1232_v49  ;;  %v618_v61 = vpop.f32.mrb[11].mxu1 }
 0x17b   : > { %690 = vst [vmem:[%s1249_s11 + $0x18] sm:$0xff] %v682_v55  ;;  %v671_v62 = vadd.f32 %v655_v56, %v430_v52  ;;  %v619_v0 = vadd.f32 %v1232_v49, %v618_v61 }
 0x17c   : > { %v658_v1 = vmax.f32 %v624_v60, 0.0 }
 0x17d   : > { %v683_v2 = vadd.f32 %v672_v58, %v671_v62  ;;  %v657_v3 = vmax.f32 %v619_v0, 0.0  ;;  %v922_v4 = vpop.f32.mrb[12].mxu1 }
 0x17e   : > { %v674_v5 = vadd.f32 %v658_v1, %v433_v59  ;;  %v634_v7 = vadd.f32 %v922_v4, %v1232_v49  ;;  %v628_v8 = vpop.f32.mrb[13].mxu1 }
 0x17f   : > { %691 = vst [vmem:[%s1249_s11 + $0x20] sm:$0xff] %v683_v2  ;;  %v673_v9 = vadd.f32 %v657_v3, %v432_v63  ;;  %v629_v11 = vadd.f32 %v1232_v49, %v628_v8 }
 0x180   : > { %v660_v12 = vmax.f32 %v634_v7, 0.0 }
 0x181   : > { %v684_v13 = vadd.f32 %v674_v5, %v673_v9  ;;  %v659_v14 = vmax.f32 %v629_v11, 0.0  ;;  %v925_v15 = vpop.f32.mrb[14].mxu1 }
 0x182   : > { %v676_v16 = vadd.f32 %v660_v12, %v435_v6  ;;  %v644_v18 = vadd.f32 %v925_v15, %v1232_v49  ;;  %v638_v47 = vpop.f32.mrb[15].mxu1 }
 0x183   : > { %692 = vst [vmem:[%s1249_s11 + $0x28] sm:$0xff] %v684_v13  ;;  %v675_v19 = vadd.f32 %v659_v14, %v434_v10  ;;  %v639_v21 = vadd.f32 %v1232_v49, %v638_v47 }
 0x184   : > { %v662_v48 = vmax.f32 %v644_v18, 0.0 }
 0x185   : > { %v685_v22 = vadd.f32 %v676_v16, %v675_v19  ;;  %v661_v23 = vmax.f32 %v639_v21, 0.0 }
 0x186   : > { %v678_v24 = vadd.f32 %v662_v48, %v437_v17 }
 0x187   : > { %693 = vst [vmem:[%s1249_s11 + $0x30] sm:$0xff] %v685_v22  ;;  %v677_v25 = vadd.f32 %v661_v23, %v436_v20 }
 0x189   : > { %v686_v49 = vadd.f32 %v678_v24, %v677_v25 }
 0x18b   : > { %694 = vst [vmem:[%s1249_s11 + $0x38] sm:$0xff] %v686_v49 }
 0x18c   : > { %997 = shalt.err (!%p994_p5)
}
 0x18d   : > { %s998_s4 = scalar_lea.hbm %s1289_s26, 1024  ;;  %s1002_s7 = scalar_lea.hbm %s1345_s3, 2048 }
 0x18e   : > { %p999_p6 = scmp.ne.s32.totalorder %s1289_s26, %s998_s4  ;;  %p1003_p10 = scmp.lt.u32.totalorder %s1289_s26, %s1345_s3 }
 0x18f   : > { %p1004_p11 = scmp.lt.u32.totalorder %s1002_s7, %s998_s4  ;;  %p1006_p13 = scmp.lt.u32.totalorder %s998_s4, %s1289_s26 }
 0x190   : > { %p1000_p7 = pnand %p999_p6, %p1128_p4 }
 0x191   : > { %p1005_p12 = por %p1004_p11, %p1003_p10 }
 0x192   : > { %p1001_p9 = pneg %p1000_p7 }
 0x193   : > { %p1007_p0 = por %p1006_p13, %p1005_p12 }
 0x195   : > { %p1008_p1 = pnand %p1007_p0, %p1001_p9 }
 0x197   : > { %1011 = shalt.err (!%p1008_p1)
}
 0x198   : > { %s1066_s10 = smov 128   ;;  %s1067_s11 = smov 8  }
 0x199   : > { %926 = dma.vmem_to_hbm [thread:$0]  (%p1128_p4), %s1291_s19, 1024, %s1289_s26, %s1296_s27, %s1066_s10, %s1066_s10, %s1067_s11  }
 0x19a PF: > { %p932_p2 = scmp.ge.s32.totalorder %s1062_s17, 2  ;;  %s726_s18 = sand.u32 1, %s1042_s12  }
 0x19b   : > { %s727_s21 = scalar_lea.sflag [#allocation3], %s726_s18 }
 0x19c   : > { %p929_p3 = pnand %p932_p2, %p1135_p8 }
 0x19e   : > { %1037 = dma.done.wait (!%p929_p3), %s727_s21, 1024  }
 0x19f   : > { %1039 = vsyncadd (!%p929_p3), %s727_s21, 4294966272  ;;  %s16_s17 = sadd.s32 1, %s1062_s17   ;;  %s1348_s12 = smov %s1046_s13 }
 0x1a0   : > { %p13_p5 = scmp.ge.s32.totalorder %s16_s17, 4   ;;  %s1349_s13 = smov %s1050_s14 }
 0x1a1   : > { %s1350_s14 = smov %s1141_s25  ;;  %s1351_s15 = smov %s1058_s16 }
 0x1a2   : > { %s1352_s16 = smov %s1354_s20  ;;  %15 = sbr.rel (!%p13_p5) target bundleno = 4 (0x4), region = 67 }
 0x1a9   :  { %732 = vsyncpa [#allocation3], 1 }
 0x1aa   :  { %734 = vsyncpa [#allocation3 + $0x1], 1 }

</bundles_post_ra>
